<compile_context>
chip_gen: v6e
topology: v6e:2x2x1
jax: 0.10.0
libtpu: 0.0.40
codegen_flags: <defaults>
</compile_context>

<pallas_src>
import functools

import jax
import jax.numpy as jnp
from jax.experimental import pallas as pl
from jax.experimental.pallas import tpu as pltpu

_LANES = 128
_SUBLANES = 8
_MAX_TILE_ROWS = 1024    # 1024 x 128 f32 = 512 KiB per input block (x2 inputs x2 bufs ~ 2 MiB)
_NUM_PARTIALS = 2        # megacore split on v7x; serialized (and still correct) on 1-TC chips


def _attack_loss_kernel(x_ref, y_ref, out_ref, acc_ref, *, n_valid):
    """Accumulate sum(sigmoid(x)*(2y-1) + 10000*y) over one (tile_rows, 128) tile."""
    p = pl.program_id(0)
    k = pl.program_id(1)
    num_k = pl.num_programs(1)

    @pl.when(k == 0)
    def _init():
        acc_ref[...] = jnp.zeros_like(acc_ref)

    tile_rows, lanes = x_ref.shape

    # Cast narrow dtypes to f32 in-kernel (VPU work, hidden under DMA).
    x = x_ref[...].astype(jnp.float32)
    y = y_ref[...].astype(jnp.float32)

    s = jax.nn.sigmoid(x)
    # Fused: correct - wrong == sum(s*(2y-1) + 10000*y)
    contrib = s * (2.0 * y - 1.0) + 10000.0 * y

    # Mask padding, overhanging rows of the last block, and duplicated
    # (clamped) blocks of the second partial.  Uses the *logical* element index
    # implied by (p, k), so clamped re-reads always land past n_valid.
    block_idx = p * num_k + k
    elem_base = block_idx * (tile_rows * lanes)
    row_ids = jax.lax.broadcasted_iota(jnp.int32, (tile_rows, lanes), 0)
    lane_ids = jax.lax.broadcasted_iota(jnp.int32, (tile_rows, lanes), 1)
    elem_idx = elem_base + row_ids * lanes + lane_ids
    contrib = jnp.where(elem_idx < n_valid, contrib, 0.0)

    acc_ref[...] += contrib

    @pl.when(k == num_k - 1)
    def _finalize():
        acc = acc_ref[...]
        # Fold the (tile_rows, 128) accumulator down to a lane-dense (8, 128) block.
        out_ref[...] = acc.reshape(tile_rows // _SUBLANES, _SUBLANES, lanes).sum(axis=0)


@jax.jit
def attack_loss(f_x_prime, labels):
    """Pallas implementation of AttackLoss.forward. Returns a float32 scalar."""
    x = jnp.ravel(f_x_prime)
    y = jnp.ravel(labels)
    n = x.shape[0]

    # Pad (only if needed) so the flat vectors view as (rows, 128) with rows % 8 == 0.
    # Padded values are irrelevant: the kernel masks everything past n.
    chunk = _SUBLANES * _LANES
    n_pad = ((n + chunk - 1) // chunk) * chunk
    if n_pad != n:
        x = jnp.pad(x, (0, n_pad - n))
        y = jnp.pad(y, (0, n_pad - n))

    rows = n_pad // _LANES
    tile_rows = min(_MAX_TILE_ROWS, rows)          # rows is a multiple of 8
    num_blocks = (rows + tile_rows - 1) // tile_rows
    num_k = (num_blocks + _NUM_PARTIALS - 1) // _NUM_PARTIALS

    x2 = x.reshape(rows, _LANES)
    y2 = y.reshape(rows, _LANES)

    def in_map(p, k):
        # Clamp so no block index is fully out of bounds; clamped re-reads are
        # zeroed by the in-kernel mask.
        return (jnp.minimum(p * num_k + k, num_blocks - 1), 0)

    kernel = functools.partial(_attack_loss_kernel, n_valid=n)

    partials = pl.pallas_call(
        kernel,
        out_shape=jax.ShapeDtypeStruct((_NUM_PARTIALS * _SUBLANES, _LANES), jnp.float32),
        grid_spec=pltpu.PrefetchScalarGridSpec(
            num_scalar_prefetch=0,
            grid=(_NUM_PARTIALS, num_k),
            in_specs=[
                pl.BlockSpec((tile_rows, _LANES), in_map),
                pl.BlockSpec((tile_rows, _LANES), in_map),
            ],
            out_specs=pl.BlockSpec((_SUBLANES, _LANES), lambda p, k: (p, 0)),
            scratch_shapes=[pltpu.VMEM((tile_rows, _LANES), jnp.float32)],
        ),
        compiler_params=pltpu.CompilerParams(
            dimension_semantics=("parallel", "arbitrary"),
        ),
    )(x2, y2)

    return jnp.sum(partials)


def _reference(f_x_prime, labels):
    s = jax.nn.sigmoid(f_x_prime.astype(jnp.float32)).ravel()
    y = labels.astype(jnp.float32).ravel()
    correct = jnp.sum(y * s)
    wrong = jnp.sum((1.0 - y) * s - 10000.0 * y)
    return correct - wrong


if __name__ == "__main__":
    key = jax.random.PRNGKey(0)
    k1, k2 = jax.random.split(key)

    # Small shapes consistent with the forward (arbitrary logit tensor + same-shape labels).
    f_x_prime = jax.random.normal(k1, (2, 4, 16, 16), dtype=jnp.float32)
    labels = (jax.random.uniform(k2, (2, 4, 16, 16)) > 0.5).astype(jnp.float32)

    result = attack_loss(f_x_prime, labels)
    jax.block_until_ready(result)

    ref = _reference(f_x_prime, labels)
    assert jnp.allclose(result, ref, rtol=1e-5, atol=1e-2), (result, ref)

    print("KERNEL_OK")
</pallas_src>

<mosaic_0001>
module attributes {stable_mosaic.version = 11 : i64} {
  func.func @_attack_loss_kernel(%arg0: i32, %arg1: i32, %arg2: memref<16x128xf32, #tpu.memory_space<vmem>>, %arg3: memref<16x128xf32, #tpu.memory_space<vmem>>, %arg4: memref<8x128xf32, #tpu.memory_space<vmem>>, %arg5: memref<16x128xf32, #tpu.memory_space<vmem>>) attributes {dimension_semantics = [#tpu.dimension_semantics<parallel>, #tpu.dimension_semantics<arbitrary>], iteration_bounds = array<i64: 2, 1>, scalar_prefetch = 0 : i64, scratch_operands = 1 : i64, tpu.core_type = #tpu.core_type<tc>, window_params = [{transform_indices = @transform_0, window_bounds = array<i64: 16, 128>}, {transform_indices = @transform_1, window_bounds = array<i64: 16, 128>}, {transform_indices = @transform_2, window_bounds = array<i64: 8, 128>}]} {
    %c0_i32 = arith.constant 0 : i32
    %0 = arith.cmpi eq, %arg1, %c0_i32 : i32
    %1 = arith.extui %0 : i1 to i32
    %c0_i32_0 = arith.constant 0 : i32
    %2 = arith.cmpi ne, %1, %c0_i32_0 : i32
    scf.if %2 {
      %cst_15 = arith.constant 0.000000e+00 : f32
      %38 = vector.broadcast %cst_15 : f32 to vector<16x128xf32>
      %c0_16 = arith.constant 0 : index
      %c0_17 = arith.constant 0 : index
      %39 = vector.load %arg5[%c0_16, %c0_17] : memref<16x128xf32, #tpu.memory_space<vmem>>, vector<16x128xf32>
      tpu.vector_store %arg5[%c0_16, %c0_17], %38 {strides = array<i32>} : memref<16x128xf32, #tpu.memory_space<vmem>>, vector<16x128xf32>,
    } else {
    }
    %c0 = arith.constant 0 : index
    %c0_1 = arith.constant 0 : index
    %3 = vector.load %arg2[%c0, %c0_1] : memref<16x128xf32, #tpu.memory_space<vmem>>, vector<16x128xf32>
    %c0_2 = arith.constant 0 : index
    %c0_3 = arith.constant 0 : index
    %4 = vector.load %arg3[%c0_2, %c0_3] : memref<16x128xf32, #tpu.memory_space<vmem>>, vector<16x128xf32>
    %5 = arith.negf %3 : vector<16x128xf32>
    %6 = math.exp %5 : vector<16x128xf32>
    %cst = arith.constant 1.000000e+00 : f32
    %7 = vector.broadcast %cst : f32 to vector<16x128xf32>
    %8 = arith.addf %7, %6 : vector<16x128xf32>
    %9 = arith.divf %7, %8 : vector<16x128xf32>
    %cst_4 = arith.constant 2.000000e+00 : f32
    %10 = vector.broadcast %cst_4 : f32 to vector<16x128xf32>
    %11 = arith.mulf %10, %4 : vector<16x128xf32>
    %cst_5 = arith.constant 1.000000e+00 : f32
    %12 = vector.broadcast %cst_5 : f32 to vector<16x128xf32>
    %13 = arith.subf %11, %12 : vector<16x128xf32>
    %14 = arith.mulf %9, %13 : vector<16x128xf32>
    %cst_6 = arith.constant 1.000000e+04 : f32
    %15 = vector.broadcast %cst_6 : f32 to vector<16x128xf32>
    %16 = arith.mulf %15, %4 : vector<16x128xf32>
    %17 = arith.addf %14, %16 : vector<16x128xf32>
    %c1_i32 = arith.constant 1 : i32
    %18 = arith.muli %arg0, %c1_i32 : i32
    %19 = arith.addi %18, %arg1 : i32
    %c2048_i32 = arith.constant 2048 : i32
    %20 = arith.muli %19, %c2048_i32 : i32
    %21 = tpu.iota {dimensions = array<i32: 0>} : vector<16x128xi32>
    %22 = tpu.iota {dimensions = array<i32: 1>} : vector<16x128xi32>
    %c128_i32 = arith.constant 128 : i32
    %23 = vector.broadcast %c128_i32 : i32 to vector<16x128xi32>
    %24 = arith.muli %21, %23 : vector<16x128xi32>
    %25 = vector.broadcast %20 : i32 to vector<16x128xi32>
    %26 = arith.addi %25, %24 : vector<16x128xi32>
    %27 = arith.addi %26, %22 : vector<16x128xi32>
    %c2048_i32_7 = arith.constant 2048 : i32
    %28 = vector.broadcast %c2048_i32_7 : i32 to vector<16x128xi32>
    %29 = arith.cmpi slt, %27, %28 : vector<16x128xi32>
    %cst_8 = arith.constant 0.000000e+00 : f32
    %30 = vector.broadcast %cst_8 : f32 to vector<16x128xf32>
    %31 = arith.select %29, %17, %30 : vector<16x128xi1>, vector<16x128xf32>
    %c0_9 = arith.constant 0 : index
    %c0_10 = arith.constant 0 : index
    %32 = vector.load %arg5[%c0_9, %c0_10] : memref<16x128xf32, #tpu.memory_space<vmem>>, vector<16x128xf32>
    %33 = arith.addf %32, %31 : vector<16x128xf32>
    %c0_11 = arith.constant 0 : index
    %c0_12 = arith.constant 0 : index
    %34 = vector.load %arg5[%c0_11, %c0_12] : memref<16x128xf32, #tpu.memory_space<vmem>>, vector<16x128xf32>
    tpu.vector_store %arg5[%c0_11, %c0_12], %33 {strides = array<i32>} : memref<16x128xf32, #tpu.memory_space<vmem>>, vector<16x128xf32>,
    %c0_i32_13 = arith.constant 0 : i32
    %35 = arith.cmpi eq, %arg1, %c0_i32_13 : i32
    %36 = arith.extui %35 : i1 to i32
    %c0_i32_14 = arith.constant 0 : i32
    %37 = arith.cmpi ne, %36, %c0_i32_14 : i32
    scf.if %37 {
      %c0_15 = arith.constant 0 : index
      %c0_16 = arith.constant 0 : index
      %38 = vector.load %arg5[%c0_15, %c0_16] : memref<16x128xf32, #tpu.memory_space<vmem>>, vector<16x128xf32>
      %39 = vector.shape_cast %38 : vector<16x128xf32> to vector<2x8x128xf32>
      %cst_17 = arith.constant dense<0.000000e+00> : vector<8x128xf32>
      %40 = vector.multi_reduction <add>, %39, %cst_17 [0] : vector<2x8x128xf32> to vector<8x128xf32>
      %c0_18 = arith.constant 0 : index
      %c0_19 = arith.constant 0 : index
      %41 = vector.load %arg4[%c0_18, %c0_19] : memref<8x128xf32, #tpu.memory_space<vmem>>, vector<8x128xf32>
      tpu.vector_store %arg4[%c0_18, %c0_19], %40 {strides = array<i32>} : memref<8x128xf32, #tpu.memory_space<vmem>>, vector<8x128xf32>,
    } else {
    }
    return
  }
  func.func @transform_0(%arg0: i32, %arg1: i32) -> (i32, i32) {
    %c1_i32 = arith.constant 1 : i32
    %0 = arith.muli %arg0, %c1_i32 : i32
    %1 = arith.addi %0, %arg1 : i32
    %c0_i32 = arith.constant 0 : i32
    %2 = arith.minsi %1, %c0_i32 : i32
    %c0_i32_0 = arith.constant 0 : i32
    %c0_i32_1 = arith.constant 0 : i32
    return %2, %c0_i32_0 : i32, i32
  }
  func.func @transform_1(%arg0: i32, %arg1: i32) -> (i32, i32) {
    %c1_i32 = arith.constant 1 : i32
    %0 = arith.muli %arg0, %c1_i32 : i32
    %1 = arith.addi %0, %arg1 : i32
    %c0_i32 = arith.constant 0 : i32
    %2 = arith.minsi %1, %c0_i32 : i32
    %c0_i32_0 = arith.constant 0 : i32
    %c0_i32_1 = arith.constant 0 : i32
    return %2, %c0_i32_0 : i32, i32
  }
  func.func @transform_2(%arg0: i32, %arg1: i32) -> (i32, i32) {
    %c0_i32 = arith.constant 0 : i32
    %c0_i32_0 = arith.constant 0 : i32
    return %arg0, %c0_i32 : i32, i32
  }
}

</mosaic_0001>

<bundles_post_ra>
// kernel: attack_loss.1
= control target key start
LH: loop header
LB: loop body
LE: loop exit
PB: predicated region body
PF: predicated region fallthrough
CT: control target
= control target key end

     0   :  { %s444_s9 = smov 0   ;;  %s446_s10 = smov 0   ;;  %s487_s0 = inlined_call_operand.vmem [shape: f32[16,128], index: 0, kind: input, shape index: {}]   ;;  %s488_s1 = inlined_call_operand.vmem [shape: f32[16,128], index: 1, kind: input, shape index: {}]   ;;  %s489_s2 = inlined_call_operand.vmem [shape: f32[16,128], index: 2, kind: output, shape index: {}]  }
   0x1   :  { %s448_s11 = smov 0  }
   0x2 LB: > { %s24_s12 = sadd.s32 1, %s423_s10  ;;  %p360_p0 = scmp.ge.s32.totalorder %s427_s11, 1  ;;  %s427_s11 = sphi %s448_s11, %s12_s11   ;;  %s423_s10 = sphi %s446_s10, %s491_s10   ;;  %s419_s9 = sphi %s444_s9, %s490_s9  }
   0x3   : > { %p26_p1 = scmp.ge.s32.totalorder %s24_s12, 2  ;;  %p160_p2 = scmp.lt.s32.totalorder %s427_s11, 3 }
   0x5   : > { %s493_s12 = smov (%p26_p1, %s24_s12), 0  ;;  %p161_p3 = pnand %p360_p0, %p160_p2 }
   0x6   : > { %p193_p4 = scmp.lt.s32.totalorder (!%p161_p3), %s419_s9, 0  ;;  %s370_s22 = sshll.u32 (!%p161_p3), %s419_s9, 11 }
   0x7   : > { %164 = sbr.rel (%p161_p3) target bundleno = 62 (0x3e), region = 28  ;;  %p216_p6 = scmp.lt.s32.totalorder (!%p161_p3), %s419_s9, 1 }
   0xc   : > { %s194_s13 = scalar_select %p193_p4, %s419_s9, 0  ;;  %v254_v4 = vlaneseq  ;;  %v261_v15 = vstv %s370_s22 }
   0xd   : > { %s497_s9 = smov (!%p216_p6, %s419_s9), 1 }
   0xe   : > { %s361_s14 = sshll.u32 %s194_s13, 1  ;;  %v255_v5 = vshrl.u32 %v254_v4, 7  ;;  %v258_v18 = vand.u32 127, %v254_v4  ;;  %s365_s23 = sshll.u32 %s497_s9, 3 }
   0xf   : > { %p196_p5 = scmp.lt.s32.totalorder %s361_s14, 1  ;;  %s219_s26 = scalar_lea.vmem %s489_s2, %s365_s23 }
  0x10   : > { %v256_v10 = vadd.s32 8, %v255_v5  ;;  %v259_v12 = vmul.u32 128, %v255_v5 }
  0x11   : > { %s495_s14 = smov (!%p196_p5, %s361_s14), 1 }
  0x12   : > { %s362_s15 = sshll.u32 %s495_s14, 3  ;;  %v260_v14 = vmul.u32 128, %v256_v10  ;;  %v262_v19 = vadd.s32 %v261_v15, %v259_v12 }
  0x13   : > { %s199_s18 = scalar_lea.vmem %s487_s0, %s362_s15  ;;  %s211_s21 = scalar_lea.vmem %s488_s1, %s362_s15 }
  0x14   : > { %v226_v0 = vld [vmem:[%s199_s18] sm:$0xff]  ;;  %v227_v1 = vld [vmem:[%s199_s18 + $0x8] sm:$0xff]  ;;  %v263_v20 = vadd.s32 %v261_v15, %v260_v14  ;;  %v264_v23 = vadd.s32 %v262_v19, %v258_v18 }
  0x15   : > { %v366_v2 = vmul.f32 -1.442695, %v226_v0  ;;  %v367_v3 = vmul.f32 -1.442695, %v227_v1  ;;  %v228_v11 = vld [vmem:[%s211_s21] sm:$0xff]  ;;  %v229_v13 = vld [vmem:[%s211_s21 + $0x8] sm:$0xff] }
  0x16   : > { %v242_v16 = vmul.f32 2.0, %v228_v11  ;;  %v243_v17 = vmul.f32 2.0, %v229_v13  ;;  %v248_v24 = vmul.f32 10000.0, %v228_v11  ;;  %v265_v25 = vadd.s32 %v263_v20, %v258_v18 }
  0x17   : > { %397 = vpow2.f32 %v366_v2  ;;  %v249_v27 = vmul.f32 10000.0, %v229_v13  ;;  %vm266_vm0 = vcmp.lt.s32.totalorder %v264_v23, 2048 }
  0x18   : > { %399 = vpow2.f32 %v367_v3  ;;  %v368_v21 = vadd.f32 -1.0, %v242_v16  ;;  %v369_v22 = vadd.f32 -1.0, %v243_v17  ;;  %vm267_vm1 = vcmp.lt.s32.totalorder %v265_v25, 2048 }
  0x24   : > { %v398_v6 = vpop.eup %397 }
  0x25   : > { %v400_v7 = vpop.eup %399  ;;  %v236_v8 = vadd.f32 1.0, %v398_v6 }
  0x26   : > { %v237_v9 = vadd.f32 1.0, %v400_v7 }
  0x27   : > { %401 = vrcp.f32 %v236_v8 }
  0x28   : > { %403 = vrcp.f32 %v237_v9 }
  0x34   : > { %v402_v26 = vpop.eup %401 }
  0x35   : > { %v404_v28 = vpop.eup %403  ;;  %v246_v29 = vmul.f32 %v402_v26, %v368_v21 }
  0x36   : > { %v247_v30 = vmul.f32 %v404_v28, %v369_v22 }
  0x37   : > { %v250_v31 = vadd.f32 %v248_v24, %v246_v29 }
  0x38   : > { %v251_v32 = vadd.f32 %v249_v27, %v247_v30 }
  0x39   : > { %v268_v33 = vsel %vm266_vm0, %v250_v31, 0.0 }
  0x3a   : > { %v269_v34 = vsel %vm267_vm1, %v251_v32, 0.0 }
  0x3b   : > { %v281_v35 = vadd.f32 %v269_v34, %v268_v33 }
  0x3d   : > { %282 = vst [vmem:[%s219_s26] sm:$0xff] %v281_v35 }
  0x3e PF: > { %s12_s11 = sadd.s32 1, %s427_s11   ;;  %s490_s9 = smov %s423_s10 }
  0x3f   : > { %p9_p7 = scmp.ge.s32.totalorder %s12_s11, 4   ;;  %s491_s10 = smov %s493_s12 }
  0x41   :  { %11 = sbr.rel (!%p9_p7) target bundleno = 2 (0x2), region = 69 }

</bundles_post_ra>
